<compile_context>
chip_gen: v5e
topology: v5e:2x2
jax: 0.10.0
libtpu: 0.0.40
codegen_flags: <defaults>
</compile_context>

<pallas_src>
import jax
import jax.numpy as jnp
from jax.experimental import pallas as pl
from jax.experimental.pallas import tpu as pltpu


def _round_up(a, b):
    return (a + b - 1) // b * b


def _sla_kernel(counts_ref, xp_ref, wqkv_ref, wp_ref, bp_ref, hmask_ref,
                out_ref):
    """One grid step = Bg window-groups; each group folds G windows into lanes."""
    Bg, L, CF = xp_ref.shape            # CF = G * C  (128 for C=32, G=4)
    f32 = jnp.float32
    bf16 = jnp.bfloat16

    # ---- fused qkv linear on the flattened (Bg*L, CF) tile (one MXU pass) ----
    x2 = xp_ref[...].reshape(Bg * L, CF)                           # bf16
    qkv = jnp.dot(x2, wqkv_ref[...], preferred_element_type=f32)   # (Bg*L, 3CF)
    q = jax.nn.relu(qkv[:, :CF])
    k = jax.nn.relu(qkv[:, CF:2 * CF])
    v = qkv[:, 2 * CF:]

    # ---- single padding mask (k only): kv / s / z all go through k ----------
    pos = jax.lax.broadcasted_iota(jnp.int32, (Bg, L, CF), 1)
    valid = (pos < counts_ref[...]).astype(f32)                    # (Bg, L, CF)
    q3 = q.reshape(Bg, L, CF)
    k3 = k.reshape(Bg, L, CF) * valid
    v3 = v.reshape(Bg, L, CF)

    hmask_bf = hmask_ref[...]                                      # (CF,CF) bf16 0/1
    hmask = hmask_bf.astype(f32)

    # per-window KV = K^T V (cross-window / cross-head lanes masked to zero)
    kv = jax.lax.dot_general(k3.astype(bf16), v3.astype(bf16),
                             (((1,), (1,)), ((0,), (0,))),
                             preferred_element_type=f32)           # (Bg, CF, CF)
    kv = kv * hmask

    # per-window sum of K  (scatter_add)
    s = jnp.sum(k3, axis=1, keepdims=True)                         # (Bg, 1, CF)

    # y = Q KV              (scatter_matmul_qc)
    y3 = jax.lax.dot_general(q3.astype(bf16), kv.astype(bf16),
                             (((2,), (1,)), ((0,), (0,))),
                             preferred_element_type=f32)           # (Bg, L, CF)

    # z = <q_h, sum_k_h>, broadcast across each head's lanes via the mask matmul
    zb = jnp.dot((q3 * s).reshape(Bg * L, CF).astype(bf16), hmask_bf,
                 preferred_element_type=f32)                       # (Bg*L, CF)

    y = y3.reshape(Bg * L, CF) * pl.reciprocal(zb + 1e-6, approx=True)

    # ---- output projection (bias in f32, bf16 store) --------------------------
    out = jnp.dot(y.astype(bf16), wp_ref[...], preferred_element_type=f32)
    out = out + bp_ref[...]
    out_ref[...] = out.reshape(Bg, L, CF).astype(out_ref.dtype)


def sla_layer(x, offsets, counts, batch_win_inds, params, num_heads, pad_len,
              block_windows=128):
    """SLALayer forward.

    pad_len: padded per-window length (>= max(counts), multiple of 16).
    block_windows: windows processed per grid step (folded by G into lanes).
    """
    N, C = x.shape
    W = offsets.shape[0]
    L = pad_len
    hd = C // num_heads

    # lane-fold factor: pack G windows into the 128-lane dimension
    G = (128 // C) if (C <= 128 and 128 % C == 0) else 1
    CF = G * C

    Wg = -(-W // G)                               # number of window groups
    Bg = max(1, block_windows // G)               # window groups per grid step
    if Wg <= Bg:
        Bg = Wg
    Wg_pad = _round_up(Wg, Bg)
    nblk = Wg_pad // Bg
    Wp = Wg_pad * G                               # padded window count

    # --- glue: gather ragged windows into a lane-folded (Wg_pad, L, CF) bf16 ---
    offsets_p = jnp.pad(offsets, (0, Wp - W)).astype(jnp.int32)
    counts_p = jnp.pad(counts, (0, Wp - W)).astype(jnp.int32)
    pos = jnp.arange(L, dtype=jnp.int32)
    off_g = offsets_p.reshape(Wg_pad, G)
    gidx = jnp.clip(off_g[:, None, :] + pos[None, :, None], 0, N - 1)  # (Wg_pad,L,G)
    xp = x.astype(jnp.bfloat16)[gidx].reshape(Wg_pad, L, CF)
    # TODO(synk): replace this gather + the final unpack with scalar-prefetch
    # driven manual DMA of the contiguous per-window row ranges.

    # counts expanded to one value per lane (lane // C selects the window slot)
    counts_lane = jnp.repeat(counts_p.reshape(Wg_pad, G), C, axis=1)
    counts_lane = counts_lane.reshape(Wg_pad, 1, CF)

    # --- weights: fold G windows as block-diagonals, fuse q/k/v -----------------
    eye_g = jnp.eye(G, dtype=jnp.float32)
    wq_t = params['wqkv'][:C].T.astype(jnp.float32)
    wk_t = params['wqkv'][C:2 * C].T.astype(jnp.float32)
    wv_t = params['wqkv'][2 * C:].T.astype(jnp.float32)
    wqkv_fold = jnp.concatenate(
        [jnp.kron(eye_g, wq_t), jnp.kron(eye_g, wk_t), jnp.kron(eye_g, wv_t)],
        axis=1).astype(jnp.bfloat16)                               # (CF, 3*CF)
    wp_fold = jnp.kron(eye_g, params['wproj'].T.astype(jnp.float32)
                       ).astype(jnp.bfloat16)                      # (CF, CF)
    bp_fold = jnp.tile(params['bproj'], G).reshape(1, CF).astype(jnp.float32)

    # combined block-diag mask: 1 iff same window slot AND same head
    ids = jnp.arange(CF, dtype=jnp.int32) // hd
    hmask = (ids[:, None] == ids[None, :]).astype(jnp.bfloat16)    # (CF, CF)

    yp = pl.pallas_call(
        _sla_kernel,
        out_shape=jax.ShapeDtypeStruct((Wg_pad, L, CF), jnp.bfloat16),
        grid_spec=pl.GridSpec(
            grid=(nblk,),
            in_specs=[
                pl.BlockSpec((Bg, 1, CF), lambda i: (i, 0, 0)),    # per-lane counts
                pl.BlockSpec((Bg, L, CF), lambda i: (i, 0, 0)),    # folded x
                pl.BlockSpec((CF, 3 * CF), lambda i: (0, 0)),      # fused qkv weight
                pl.BlockSpec((CF, CF), lambda i: (0, 0)),          # proj weight
                pl.BlockSpec((1, CF), lambda i: (0, 0)),           # proj bias
                pl.BlockSpec((CF, CF), lambda i: (0, 0)),          # window+head mask
            ],
            out_specs=pl.BlockSpec((Bg, L, CF), lambda i: (i, 0, 0)),
        ),
        compiler_params=pltpu.CompilerParams(
            dimension_semantics=("parallel",),
            vmem_limit_bytes=48 * 1024 * 1024,
        ),
    )(counts_lane, xp, wqkv_fold, wp_fold, bp_fold, hmask)

    # --- glue: unfold lanes back to per-window, then to the (N, C) row layout ---
    yp = yp.reshape(Wg_pad, L, G, C).transpose(0, 2, 1, 3).reshape(Wp, L, C)
    pos_in_win = jnp.arange(N, dtype=jnp.int32) - offsets[batch_win_inds]
    return yp[batch_win_inds, pos_in_win].astype(x.dtype)


def sla_reference(x, offsets, counts, batch_win_inds, params, num_heads):
    """Pure-JAX (f32) reference matching the PyTorch forward semantics."""
    N, C = x.shape
    hd = C // num_heads
    W = offsets.shape[0]
    qkv = x @ params['wqkv'].T
    q, k, v = jnp.split(qkv, 3, axis=-1)
    q = jax.nn.relu(q).reshape(N, num_heads, hd)
    k = jax.nn.relu(k).reshape(N, num_heads, hd)
    v = v.reshape(N, num_heads, hd)
    kv = jnp.einsum('nhk,nhv->nhkv', k, v)
    kv_w = jax.ops.segment_sum(kv, batch_win_inds, num_segments=W)   # scatter_matmul_kv
    s_w = jax.ops.segment_sum(k, batch_win_inds, num_segments=W)     # scatter_add
    y = jnp.einsum('nhk,nhkv->nhv', q, kv_w[batch_win_inds])         # scatter_matmul_qc
    z = jnp.sum(s_w[batch_win_inds] * q, -1, keepdims=True)
    y = (y / (z + 1e-6)).reshape(N, C)
    return y @ params['wproj'].T + params['bproj']


if __name__ == "__main__":
    dim, num_heads = 32, 4
    counts = jnp.array([6, 10, 12, 12], dtype=jnp.int32)
    offsets = jnp.concatenate(
        [jnp.zeros((1,), jnp.int32), jnp.cumsum(counts)[:-1]]).astype(jnp.int32)
    N = int(jnp.sum(counts))
    batch_win_inds = jnp.repeat(
        jnp.arange(counts.shape[0], dtype=jnp.int32), counts,
        total_repeat_length=N)

    key = jax.random.PRNGKey(0)
    k1, k2, k3, k4 = jax.random.split(key, 4)
    x = jax.random.normal(k1, (N, dim), jnp.float32)
    params = {
        'wqkv': 0.1 * jax.random.normal(k2, (3 * dim, dim), jnp.float32),
        'wproj': 0.1 * jax.random.normal(k3, (dim, dim), jnp.float32),
        'bproj': 0.1 * jax.random.normal(k4, (dim,), jnp.float32),
    }

    pad_len = 16  # >= max(counts), multiple of 16 (bf16 sublane tile)
    out = sla_layer(x, offsets, counts, batch_win_inds, params, num_heads,
                    pad_len, block_windows=128)
    jax.block_until_ready(out)

    ref = sla_reference(x, offsets, counts, batch_win_inds, params, num_heads)
    assert out.shape == (N, dim)
    # bf16 matmul inputs + bf16 output store (f32 accumulation) => loose tol
    err = float(jnp.max(jnp.abs(out - ref)))
    assert jnp.allclose(out, ref, rtol=2e-2, atol=2e-2), err
    print("KERNEL_OK")
</pallas_src>

<mosaic_0001>
module attributes {stable_mosaic.version = 11 : i64} {
  func.func @_sla_kernel(%arg0: i32, %arg1: memref<1x1x128xi32, #tpu.memory_space<vmem>>, %arg2: memref<1x16x128xbf16, #tpu.memory_space<vmem>>, %arg3: memref<128x384xbf16, #tpu.memory_space<vmem>>, %arg4: memref<128x128xbf16, #tpu.memory_space<vmem>>, %arg5: memref<1x128xf32, #tpu.memory_space<vmem>>, %arg6: memref<128x128xbf16, #tpu.memory_space<vmem>>, %arg7: memref<1x16x128xbf16, #tpu.memory_space<vmem>>) attributes {dimension_semantics = [#tpu.dimension_semantics<parallel>], iteration_bounds = array<i64: 1>, scalar_prefetch = 0 : i64, scratch_operands = 0 : i64, tpu.core_type = #tpu.core_type<tc>, window_params = [{transform_indices = @transform_0, window_bounds = array<i64: 1, 1, 128>}, {transform_indices = @transform_1, window_bounds = array<i64: 1, 16, 128>}, {pipeline_mode = #tpu.pipeline_mode<synchronous>, transform_indices = @transform_2, window_bounds = array<i64: 128, 384>}, {pipeline_mode = #tpu.pipeline_mode<synchronous>, transform_indices = @transform_3, window_bounds = array<i64: 128, 128>}, {pipeline_mode = #tpu.pipeline_mode<synchronous>, transform_indices = @transform_4, window_bounds = array<i64: 1, 128>}, {pipeline_mode = #tpu.pipeline_mode<synchronous>, transform_indices = @transform_5, window_bounds = array<i64: 128, 128>}, {transform_indices = @transform_6, window_bounds = array<i64: 1, 16, 128>}]} {
    %c0 = arith.constant 0 : index
    %c0_0 = arith.constant 0 : index
    %c0_1 = arith.constant 0 : index
    %0 = vector.load %arg2[%c0, %c0_0, %c0_1] : memref<1x16x128xbf16, #tpu.memory_space<vmem>>, vector<1x16x128xbf16>
    %1 = vector.shape_cast %0 : vector<1x16x128xbf16> to vector<16x128xbf16>
    %c0_2 = arith.constant 0 : index
    %c0_3 = arith.constant 0 : index
    %2 = vector.load %arg3[%c0_2, %c0_3] : memref<128x384xbf16, #tpu.memory_space<vmem>>, vector<128x384xbf16>
    %cst = arith.constant dense<0.000000e+00> : vector<16x384xf32>
    %3 = tpu.matmul %1, %2, %cst {dimension_numbers = #tpu.dot_dimension_numbers<[1], [0], [0], [1], [0, 0, 1, 1], [], []>} : vector<16x128xbf16>, vector<128x384xbf16>, vector<16x384xf32> -> vector<16x384xf32>
    %4 = vector.extract_strided_slice %3 {offsets = [0, 0], sizes = [16, 128], strides = [1, 1]} : vector<16x384xf32> to vector<16x128xf32>
    %cst_4 = arith.constant 0.000000e+00 : f32
    %5 = vector.broadcast %cst_4 : f32 to vector<16x128xf32>
    %6 = arith.maximumf %4, %5 : vector<16x128xf32>
    %7 = vector.extract_strided_slice %3 {offsets = [0, 128], sizes = [16, 128], strides = [1, 1]} : vector<16x384xf32> to vector<16x128xf32>
    %cst_5 = arith.constant 0.000000e+00 : f32
    %8 = vector.broadcast %cst_5 : f32 to vector<16x128xf32>
    %9 = arith.maximumf %7, %8 : vector<16x128xf32>
    %10 = vector.extract_strided_slice %3 {offsets = [0, 256], sizes = [16, 128], strides = [1, 1]} : vector<16x384xf32> to vector<16x128xf32>
    %11 = tpu.iota {dimensions = array<i32: 1>} : vector<1x16x128xi32>
    %c0_6 = arith.constant 0 : index
    %c0_7 = arith.constant 0 : index
    %c0_8 = arith.constant 0 : index
    %12 = vector.load %arg1[%c0_6, %c0_7, %c0_8] : memref<1x1x128xi32, #tpu.memory_space<vmem>>, vector<1x1x128xi32>
    %13 = vector.broadcast %12 : vector<1x1x128xi32> to vector<1x16x128xi32>
    %14 = arith.cmpi slt, %11, %13 : vector<1x16x128xi32>
    %15 = arith.extui %14 : vector<1x16x128xi1> to vector<1x16x128xi32>
    %16 = arith.sitofp %15 : vector<1x16x128xi32> to vector<1x16x128xf32>
    %17 = vector.shape_cast %6 : vector<16x128xf32> to vector<1x16x128xf32>
    %18 = vector.shape_cast %9 : vector<16x128xf32> to vector<1x16x128xf32>
    %19 = arith.mulf %18, %16 : vector<1x16x128xf32>
    %20 = vector.shape_cast %10 : vector<16x128xf32> to vector<1x16x128xf32>
    %c0_9 = arith.constant 0 : index
    %c0_10 = arith.constant 0 : index
    %21 = vector.load %arg6[%c0_9, %c0_10] : memref<128x128xbf16, #tpu.memory_space<vmem>>, vector<128x128xbf16>
    %22 = arith.extf %21 : vector<128x128xbf16> to vector<128x128xf32>
    %23 = arith.truncf %19 : vector<1x16x128xf32> to vector<1x16x128xbf16>
    %24 = arith.truncf %20 : vector<1x16x128xf32> to vector<1x16x128xbf16>
    %cst_11 = arith.constant dense<0.000000e+00> : vector<1x128x128xf32>
    %25 = tpu.matmul %23, %24, %cst_11 {dimension_numbers = #tpu.dot_dimension_numbers<[1], [1], [2], [2], [0, 0, 0, 2, 1, 2], [0], [0]>} : vector<1x16x128xbf16>, vector<1x16x128xbf16>, vector<1x128x128xf32> -> vector<1x128x128xf32>
    %26 = vector.shape_cast %22 : vector<128x128xf32> to vector<1x128x128xf32>
    %27 = arith.mulf %25, %26 : vector<1x128x128xf32>
    %cst_12 = arith.constant dense<0.000000e+00> : vector<1x128xf32>
    %28 = vector.multi_reduction <add>, %19, %cst_12 [1] : vector<1x16x128xf32> to vector<1x128xf32>
    %29 = vector.shape_cast %28 : vector<1x128xf32> to vector<1x1x128xf32>
    %30 = arith.truncf %17 : vector<1x16x128xf32> to vector<1x16x128xbf16>
    %31 = arith.truncf %27 : vector<1x128x128xf32> to vector<1x128x128xbf16>
    %cst_13 = arith.constant dense<0.000000e+00> : vector<1x16x128xf32>
    %32 = tpu.matmul %30, %31, %cst_13 {dimension_numbers = #tpu.dot_dimension_numbers<[2], [1], [1], [2], [0, 0, 0, 1, 1, 2], [0], [0]>} : vector<1x16x128xbf16>, vector<1x128x128xbf16>, vector<1x16x128xf32> -> vector<1x16x128xf32>
    %33 = vector.broadcast %29 : vector<1x1x128xf32> to vector<1x16x128xf32>
    %34 = arith.mulf %17, %33 : vector<1x16x128xf32>
    %35 = vector.shape_cast %34 : vector<1x16x128xf32> to vector<16x128xf32>
    %36 = arith.truncf %35 : vector<16x128xf32> to vector<16x128xbf16>
    %cst_14 = arith.constant dense<0.000000e+00> : vector<16x128xf32>
    %37 = tpu.matmul %36, %21, %cst_14 {dimension_numbers = #tpu.dot_dimension_numbers<[1], [0], [0], [1], [0, 0, 1, 1], [], []>} : vector<16x128xbf16>, vector<128x128xbf16>, vector<16x128xf32> -> vector<16x128xf32>
    %38 = vector.shape_cast %32 : vector<1x16x128xf32> to vector<16x128xf32>
    %cst_15 = arith.constant 9.99999997E-7 : f32
    %39 = vector.broadcast %cst_15 : f32 to vector<16x128xf32>
    %40 = arith.addf %37, %39 : vector<16x128xf32>
    %41 = tpu.reciprocal %40 {approx = true} : vector<16x128xf32> -> vector<16x128xf32>
    %42 = arith.mulf %38, %41 : vector<16x128xf32>
    %43 = arith.truncf %42 : vector<16x128xf32> to vector<16x128xbf16>
    %c0_16 = arith.constant 0 : index
    %c0_17 = arith.constant 0 : index
    %44 = vector.load %arg4[%c0_16, %c0_17] : memref<128x128xbf16, #tpu.memory_space<vmem>>, vector<128x128xbf16>
    %cst_18 = arith.constant dense<0.000000e+00> : vector<16x128xf32>
    %45 = tpu.matmul %43, %44, %cst_18 {dimension_numbers = #tpu.dot_dimension_numbers<[1], [0], [0], [1], [0, 0, 1, 1], [], []>} : vector<16x128xbf16>, vector<128x128xbf16>, vector<16x128xf32> -> vector<16x128xf32>
    %c0_19 = arith.constant 0 : index
    %c0_20 = arith.constant 0 : index
    %46 = vector.load %arg5[%c0_19, %c0_20] : memref<1x128xf32, #tpu.memory_space<vmem>>, vector<1x128xf32>
    %47 = vector.broadcast %46 : vector<1x128xf32> to vector<16x128xf32>
    %48 = arith.addf %45, %47 : vector<16x128xf32>
    %49 = vector.shape_cast %48 : vector<16x128xf32> to vector<1x16x128xf32>
    %50 = arith.truncf %49 : vector<1x16x128xf32> to vector<1x16x128xbf16>
    %c0_21 = arith.constant 0 : index
    %c0_22 = arith.constant 0 : index
    %c0_23 = arith.constant 0 : index
    %51 = vector.load %arg7[%c0_21, %c0_22, %c0_23] : memref<1x16x128xbf16, #tpu.memory_space<vmem>>, vector<1x16x128xbf16>
    tpu.vector_store %arg7[%c0_21, %c0_22, %c0_23], %50 {strides = array<i32>} : memref<1x16x128xbf16, #tpu.memory_space<vmem>>, vector<1x16x128xbf16>,
    return
  }
  func.func @transform_0(%arg0: i32) -> (i32, i32, i32) {
    %c0_i32 = arith.constant 0 : i32
    %c0_i32_0 = arith.constant 0 : i32
    %c0_i32_1 = arith.constant 0 : i32
    return %arg0, %c0_i32, %c0_i32_0 : i32, i32, i32
  }
  func.func @transform_1(%arg0: i32) -> (i32, i32, i32) {
    %c0_i32 = arith.constant 0 : i32
    %c0_i32_0 = arith.constant 0 : i32
    %c0_i32_1 = arith.constant 0 : i32
    return %arg0, %c0_i32, %c0_i32_0 : i32, i32, i32
  }
  func.func @transform_2(%arg0: i32) -> (i32, i32) {
    %c0_i32 = arith.constant 0 : i32
    %c0_i32_0 = arith.constant 0 : i32
    %c0_i32_1 = arith.constant 0 : i32
    return %c0_i32, %c0_i32_0 : i32, i32
  }
  func.func @transform_3(%arg0: i32) -> (i32, i32) {
    %c0_i32 = arith.constant 0 : i32
    %c0_i32_0 = arith.constant 0 : i32
    %c0_i32_1 = arith.constant 0 : i32
    return %c0_i32, %c0_i32_0 : i32, i32
  }
  func.func @transform_4(%arg0: i32) -> (i32, i32) {
    %c0_i32 = arith.constant 0 : i32
    %c0_i32_0 = arith.constant 0 : i32
    %c0_i32_1 = arith.constant 0 : i32
    return %c0_i32, %c0_i32_0 : i32, i32
  }
  func.func @transform_5(%arg0: i32) -> (i32, i32) {
    %c0_i32 = arith.constant 0 : i32
    %c0_i32_0 = arith.constant 0 : i32
    %c0_i32_1 = arith.constant 0 : i32
    return %c0_i32, %c0_i32_0 : i32, i32
  }
  func.func @transform_6(%arg0: i32) -> (i32, i32, i32) {
    %c0_i32 = arith.constant 0 : i32
    %c0_i32_0 = arith.constant 0 : i32
    %c0_i32_1 = arith.constant 0 : i32
    return %arg0, %c0_i32, %c0_i32_0 : i32, i32, i32
  }
}

</mosaic_0001>

<bundles_post_ra>
// kernel: tpu_custom_call.1
= control target key start
LH: loop header
LB: loop body
LE: loop exit
PB: predicated region body
PF: predicated region fallthrough
CT: control target
= control target key end

     0   :  { %11 = vsyncpa [#allocation3], 0  ;;  %s1265_s0 = inlined_call_operand.hbm [shape: s32[1,1,128], index: 0, kind: input, shape index: {}]   ;;  %s1266_s1 = inlined_call_operand.hbm [shape: bf16[1,16,128], index: 1, kind: input, shape index: {}]   ;;  %s1267_s2 = inlined_call_operand.hbm [shape: bf16[128,384], index: 2, kind: input, shape index: {}]   ;;  %s1268_s3 = inlined_call_operand.hbm [shape: bf16[128,128], index: 3, kind: input, shape index: {}]   ;;  %s1269_s4 = inlined_call_operand.vmem [shape: f32[1,128], index: 4, kind: input, shape index: {}]   ;;  %s1270_s5 = inlined_call_operand.hbm [shape: bf16[128,128], index: 5, kind: input, shape index: {}]   ;;  %s1271_s6 = inlined_call_operand.hbm [shape: bf16[1,16,128], index: 6, kind: output, shape index: {}]  }
   0x1   :  { %12 = vsyncpa [#allocation6], 0 }
   0x2   :  { %13 = vsyncpa [#allocation9], 0  ;;  %s30_s23 = sshll.u32 %s1266_s1, 4  ;;  %s31_s23 = int_to_ptr.hbm [resolvable:$true] %s30_s23 }
   0x3   :  { %14 = vsyncpa [#allocation4], 0  ;;  %s1143_s24 = smov [#allocation5]   ;;  %s56_s28 = sshll.u32 %s1268_s3, 4  ;;  %s57_s28 = int_to_ptr.hbm [resolvable:$true] %s56_s28 }
   0x4   :  { %s32_s25 = sshll.u32 %s1143_s24, 4  ;;  %s1144_s29 = smov 64   ;;  %s33_s25 = int_to_ptr.vmem [resolvable:$true] %s32_s25 }
   0x5   :  { %s1145_s30 = smov 4   ;;  %s1146_s7 = smov [#allocation8]  }
   0x6   :  { %38 = dma.hbm_to_vmem [thread:$0]  %s31_s23, 128, %s33_s25, [#allocation6], %s1144_s29, %s1144_s29, %s1145_s30  }
   0x7   :  { %s58_s8 = sshll.u32 %s1146_s7, 4  ;;  %s20_s10 = sshll.u32 %s1265_s0, 4  ;;  %s59_s8 = int_to_ptr.vmem [resolvable:$true] %s58_s8  ;;  %s21_s10 = int_to_ptr.hbm [resolvable:$true] %s20_s10 }
   0x8   :  { %64 = dma.hbm_to_vmem [thread:$0]  %s57_s28, 1024, %s59_s8, [#allocation9], %s1144_s29, %s1144_s29, %s1145_s30  }
   0x9   :  { %s43_s12 = sshll.u32 %s1267_s2, 4  ;;  %s1147_s13 = smov [#allocation2]   ;;  %s44_s12 = int_to_ptr.hbm [resolvable:$true] %s43_s12 }
   0xa   :  { %s22_s14 = sshll.u32 %s1147_s13, 4  ;;  %s1148_s15 = smov [#allocation7]   ;;  %s23_s14 = int_to_ptr.vmem [resolvable:$true] %s22_s14 }
   0xb   :  { %25 = dma.hbm_to_vmem [thread:$0]  %s21_s10, 16, %s23_s14, [#allocation3]  }
   0xc   :  { %s45_s16 = sshll.u32 %s1148_s15, 4  ;;  %s1149_s17 = smov 192   ;;  %s46_s16 = int_to_ptr.vmem [resolvable:$true] %s45_s16 }
   0xd   :  { %s1150_s0 = smov 12   ;;  %s71_s20 = sshll.u32 %s1270_s5, 4  ;;  %s72_s20 = int_to_ptr.hbm [resolvable:$true] %s71_s20 }
   0xe   :  { %51 = dma.hbm_to_vmem [thread:$0]  %s44_s12, 3072, %s46_s16, [#allocation6], %s1149_s17, %s1149_s17, %s1150_s0  }
   0xf   :  { %s1151_s21 = smov [#allocation10]  }
  0x10   :  { %s73_s22 = sshll.u32 %s1151_s21, 4  ;;  %s74_s22 = int_to_ptr.vmem [resolvable:$true] %s73_s22 }
  0x11   :  { %79 = dma.hbm_to_vmem [thread:$0]  %s72_s20, 1024, %s74_s22, [#allocation9], %s1144_s29, %s1144_s29, %s1145_s30  }
  0x12   :  { %1135 = dma.done.wait [#allocation3], 16  }
  0x13   :  { %1136 = vsyncadd [#allocation3], 4294967280 }
  0x14   :  { %1137 = dma.done.wait [#allocation6], 3200  }
  0x15   :  { %1138 = vsyncadd [#allocation6], 4294964096 }
  0x16   :  { %1139 = dma.done.wait [#allocation9], 2048  }
  0x17   :  { %1140 = vsyncadd [#allocation9], 4294965248  ;;  %v948_v0 = vld [vmem:[#allocation7 + $0xac] sm:$0xf]  ;;  %v844_v1 = vld [vmem:[#allocation7 + $0xb4] sm:$0xf0] }
  0x18   :  { %v945_v2 = vld [vmem:[#allocation7 + $0x94] sm:$0xf]  ;;  %v847_v3 = vor.u32 %v948_v0, %v844_v1  ;;  %v832_v4 = vld [vmem:[#allocation7 + $0x9c] sm:$0xf0]  ;;  %v842_v5 = vld [vmem:[#allocation7 + $0xa8] sm:$0xf] }
  0x19   :  { %v835_v6 = vor.u32 %v945_v2, %v832_v4  ;;  %v942_v7 = vld [vmem:[#allocation7 + $0x7c] sm:$0xf]  ;;  %v949_v8 = vld [vmem:[#allocation7 + $0xb0] sm:$0xf0]  ;;  %v820_v9 = vld [vmem:[#allocation7 + $0x84] sm:$0xf0]  ;;  %v315_v4 = vlaneseq }
  0x1a   :  { %283 = vmatpush.bf16.msra.mxu1 %v847_v3  ;;  %v843_v10 = vor.u32 %v949_v8, %v842_v5  ;;  %v830_v11 = vld [vmem:[#allocation7 + $0x90] sm:$0xf]  ;;  %v946_v12 = vld [vmem:[#allocation7 + $0x98] sm:$0xf0]  ;;  %v823_v14 = vor.u32 %v942_v7, %v820_v9  ;;  %v818_v15 = vld [vmem:[#allocation7 + $0x78] sm:$0xf] }
  0x1b   :  { %v831_v13 = vor.u32 %v946_v12, %v830_v11  ;;  %v943_v16 = vld [vmem:[#allocation7 + $0x80] sm:$0xf0]  ;;  %v808_v18 = vld [vmem:[#allocation7 + $0x6c] sm:$0xf0]  ;;  %v806_v20 = vld [vmem:[#allocation7 + $0x60] sm:$0xf] }
  0x1c   :  { %269 = vmatpush.bf16.msra.mxu0 %v843_v10  ;;  %v939_v17 = vld [vmem:[#allocation7 + $0x64] sm:$0xf]  ;;  %v819_v19 = vor.u32 %v943_v16, %v818_v15  ;;  %v940_v22 = vld [vmem:[#allocation7 + $0x68] sm:$0xf0]  ;;  %v796_v24 = vld [vmem:[#allocation7 + $0x54] sm:$0xf0] }
  0x1d   :  { %v811_v21 = vor.u32 %v939_v17, %v808_v18  ;;  %v936_v23 = vld [vmem:[#allocation7 + $0x4c] sm:$0xf]  ;;  %v807_v25 = vor.u32 %v940_v22, %v806_v20  ;;  %v794_v27 = vld [vmem:[#allocation7 + $0x48] sm:$0xf]  ;;  %v937_v28 = vld [vmem:[#allocation7 + $0x50] sm:$0xf0] }
  0x1e   :  { %284 = vmatpush.bf16.msra.mxu1 %v835_v6  ;;  %v799_v26 = vor.u32 %v936_v23, %v796_v24  ;;  %v933_v29 = vld [vmem:[#allocation7 + $0x34] sm:$0xf]  ;;  %v784_v30 = vld [vmem:[#allocation7 + $0x3c] sm:$0xf0]  ;;  %v795_v31 = vor.u32 %v937_v28, %v794_v27  ;;  %v782_v33 = vld [vmem:[#allocation7 + $0x30] sm:$0xf] }
  0x1f   :  { %v787_v32 = vor.u32 %v933_v29, %v784_v30  ;;  %v934_v34 = vld [vmem:[#allocation7 + $0x38] sm:$0xf0]  ;;  %v772_v36 = vld [vmem:[#allocation7 + $0x24] sm:$0xf0]  ;;  %v770_v39 = vld [vmem:[#allocation7 + $0x18] sm:$0xf] }
  0x20   :  { %270 = vmatpush.bf16.msra.mxu0 %v831_v13  ;;  %v930_v35 = vld [vmem:[#allocation7 + $0x1c] sm:$0xf]  ;;  %v783_v37 = vor.u32 %v934_v34, %v782_v33  ;;  %v931_v40 = vld [vmem:[#allocation7 + $0x20] sm:$0xf0]  ;;  %v760_v42 = vld [vmem:[#allocation7 + $0xc] sm:$0xf0] }
  0x21   :  { %v775_v38 = vor.u32 %v930_v35, %v772_v36  ;;  %v927_v41 = vld [vmem:[#allocation7 + $0x4] sm:$0xf]  ;;  %v771_v43 = vor.u32 %v931_v40, %v770_v39  ;;  %v758_v45 = vld [vmem:[#allocation7] sm:$0xf]  ;;  %v928_v46 = vld [vmem:[#allocation7 + $0x8] sm:$0xf0] }
  0x22   :  { %285 = vmatpush.bf16.msra.mxu1 %v823_v14  ;;  %v763_v44 = vor.u32 %v927_v41, %v760_v42  ;;  %v1213_v47 = vld [vmem:[#allocation5] sm:$0xff]  ;;  %v759_v48 = vor.u32 %v928_v46, %v758_v45  ;;  %v957_v50 = vld [vmem:[#allocation10 + $0x30] sm:$0xff]  ;;  %v956_v51 = vld [vmem:[#allocation10 + $0x28] sm:$0xff]  ;;  %v316_v9 = vshrl.u32 %v315_v4, 7  ;;  %v1152_v23 = vmov 0.0   ;;  %s1153_s23 = smov [#allocation11]  }
  0x23   :  { %v958_v49 = vld [vmem:[#allocation10 + $0x38] sm:$0xff]  ;;  %v850_v52 = vld [vmem:[#allocation7 + $0xb0] sm:$0xf]  ;;  %v955_v55 = vld [vmem:[#allocation10 + $0x20] sm:$0xff]  ;;  %vm392_vm2 = vcmask 130048   ;;  %s735_s24 = sshll.u32 %s1153_s23, 4  ;;  %s736_s24 = int_to_ptr.vmem [resolvable:$true] %s735_s24 }
  0x24   :  { %271 = vmatpush.bf16.msra.mxu0 %v819_v19  ;;  %v950_v53 = vld [vmem:[#allocation7 + $0xb8] sm:$0xf0]  ;;  %v838_v56 = vld [vmem:[#allocation7 + $0x98] sm:$0xf]  ;;  %v947_v57 = vld [vmem:[#allocation7 + $0xa0] sm:$0xf0] }
  0x25   :  { %v851_v54 = vor.u32 %v950_v53, %v850_v52  ;;  %v839_v58 = vor.u32 %v947_v57, %v838_v56  ;;  %v954_v59 = vld [vmem:[#allocation10 + $0x18] sm:$0xff]  ;;  %v826_v60 = vld [vmem:[#allocation7 + $0x80] sm:$0xf]  ;;  %v944_v61 = vld [vmem:[#allocation7 + $0x88] sm:$0xf0]  ;;  %v317_v18 = vadd.s32 8, %v316_v9 }
  0x26   :  { %286 = vmatpush.bf16.msra.mxu1 %v811_v21  ;;  %v827_v62 = vor.u32 %v944_v61, %v826_v60  ;;  %v953_v63 = vld [vmem:[#allocation10 + $0x10] sm:$0xff]  ;;  %v814_v0 = vld [vmem:[#allocation7 + $0x68] sm:$0xf]  ;;  %v938_v6 = vld [vmem:[#allocation7 + $0x58] sm:$0xf0]  ;;  %s737_s27 = sshll.u32 %s1271_s6, 4  ;;  %s738_s27 = int_to_ptr.hbm [resolvable:$true] %s737_s27 }
  0x27   :  { %297 = vmatpush.bf16.msra.mxu2 %v851_v54  ;;  %v941_v1 = vld [vmem:[#allocation7 + $0x70] sm:$0xf0]  ;;  %v952_v3 = vld [vmem:[#allocation10 + $0x8] sm:$0xff]  ;;  %v802_v5 = vld [vmem:[#allocation7 + $0x50] sm:$0xf] }
  0x28   :  { %272 = vmatpush.bf16.msra.mxu0 %v807_v25  ;;  %v815_v2 = vor.u32 %v941_v1, %v814_v0  ;;  %v803_v7 = vor.u32 %v938_v6, %v802_v5  ;;  %v951_v8 = vld [vmem:[#allocation10] sm:$0xff]  ;;  %v985_v10 = vld [vmem:[#allocation2] ss:$0 sm:$0xff]  ;;  %v790_v11 = vld [vmem:[#allocation7 + $0x38] sm:$0xf] }
  0x29   :  { %v935_v12 = vld [vmem:[#allocation7 + $0x40] sm:$0xf0]  ;;  %v778_v14 = vld [vmem:[#allocation7 + $0x20] sm:$0xf]  ;;  %v932_v15 = vld [vmem:[#allocation7 + $0x28] sm:$0xf0]  ;;  %vm320_vm0 = vcmp.lt.s32.totalorder %v316_v9, %v985_v10  ;;  %vm321_vm1 = vcmp.lt.s32.totalorder %v317_v18, %v985_v10 }
  0x2a   :  { %287 = vmatpush.bf16.msra.mxu1 %v799_v26  ;;  %v791_v13 = vor.u32 %v935_v12, %v790_v11  ;;  %v779_v17 = vor.u32 %v932_v15, %v778_v14  ;;  %v766_v19 = vld [vmem:[#allocation7 + $0x8] sm:$0xf]  ;;  %v929_v20 = vld [vmem:[#allocation7 + $0x10] sm:$0xf0]  ;;  %v852_v24 = vsel %vm320_vm0, 1.0, %v1152_v23  ;;  %v853_v28 = vsel %vm321_vm1, 1.0, %v1152_v23 }
  0x2b   :  { %298 = vmatpush.bf16.msra.mxu2 %v839_v58  ;;  %v767_v25 = vor.u32 %v929_v20, %v766_v19  ;;  %v332_v5 = vld [vmem:[#allocation10 + $0x10] sm:$0xff]  }
  0x2c   :  { %273 = vmatpush.bf16.msra.mxu0 %v795_v31  ;;  %v349_v9 = vunpack.c.h.bf16 %v332_v5 }
  0x2e   :  { %288 = vmatpush.bf16.msra.mxu1 %v787_v32 }
  0x2f   :  { %299 = vmatpush.bf16.msra.mxu2 %v827_v62 }
  0x30   :  { %274 = vmatpush.bf16.msra.mxu0 %v783_v37 }
  0x32   :  { %289 = vmatpush.bf16.msra.mxu1 %v775_v38 }
  0x33   :  { %300 = vmatpush.bf16.msra.mxu2 %v815_v2 }
  0x34   :  { %275 = vmatpush.bf16.msra.mxu0 %v771_v43 }
  0x36   :  { %290 = vmatpush.bf16.msra.mxu1 %v763_v44 }
  0x37   :  { %301 = vmatpush.bf16.msra.mxu2 %v803_v7  ;;  %v348_v7 = vunpack.c.l.bf16 %v332_v5 }
  0x38   :  { %276 = vmatpush.bf16.msra.mxu0 %v759_v48 }
  0x39   :  { %291 = vmatmul.bf16.vlgmr.msra.gmra.mxu1 %v1213_v47 }
  0x3a   :  { %626 = vmatpush.bf16.msrb.mxu1 %v958_v49 }
  0x3b   :  { %277 = vmatmul.bf16.vlgmr.msra.gmra.mxu0 %v1213_v47  ;;  %302 = vmatpush.bf16.msra.mxu2 %v791_v13 }
  0x3e   :  { %627 = vmatpush.bf16.msrb.mxu1 %v957_v50 }
  0x3f   :  { %303 = vmatpush.bf16.msra.mxu2 %v779_v17 }
  0x42   :  { %628 = vmatpush.bf16.msrb.mxu1 %v956_v51 }
  0x43   :  { %304 = vmatpush.bf16.msra.mxu2 %v767_v25 }
  0x46   :  { %629 = vmatpush.bf16.msrb.mxu1 %v955_v55  ;;  %305 = vmatmul.bf16.vlgmr.msra.gmra.mxu2 %v1213_v47 }
  0x4a   :  { %630 = vmatpush.bf16.msrb.mxu1 %v954_v59 }
  0x4e   :  { %631 = vmatpush.bf16.msrb.mxu1 %v953_v63 }
  0x52   :  { %632 = vmatpush.bf16.msrb.mxu1 %v952_v3 }
  0x56   :  { %633 = vmatpush.bf16.msrb.mxu1 %v951_v8 }
  0xb6   :  { %v292_v16 = vpop.f32.mrf.mxu1 }
  0xb7   :  { %v313_v21 = vmax.f32 %v292_v16, 0.0  ;;  %v334_v16 = vld [vmem:[#allocation10 + $0x18] sm:$0xff]  }
  0xb8   :  { %v278_v22 = vpop.f32.mrf.mxu0  ;;  %v350_v19 = vunpack.c.l.bf16 %v334_v16 }
  0xb9   :  { %v326_v26 = vmul.f32 %v852_v24, %v313_v21  ;;  %v311_v29 = vmax.f32 %v278_v22, 0.0  ;;  %v351_v21 = vunpack.c.h.bf16 %v334_v16 }
  0xbb   :  { %v489_v31 = vpack.c.bf16 %v311_v29, %v311_v29  ;;  %v360_v33 = vpack.c.bf16 %v326_v26, %v326_v26 }
  0xbd   :  { %v1218_v38 = vunpack.c.l.b16 %v489_v31  ;;  %v366_v41 = vunpack.c.l.b16 %v360_v33 }
  0xbe   :  { %v294_v27 = vpop.f32.mrf.mxu1 }
  0xbf   :  { %v314_v30 = vmax.f32 %v294_v27, 0.0 }
  0xc0   :  { %v280_v34 = vpop.f32.mrf.mxu0 }
  0xc1   :  { %v327_v32 = vmul.f32 %v853_v28, %v314_v30  ;;  %v312_v35 = vmax.f32 %v280_v34, 0.0 }
  0xc3   :  { %v482_v36 = vadd.f32 %v327_v32, %v326_v26  ;;  %v361_v37 = vpack.c.bf16 %v327_v32, %v327_v32  ;;  %v490_v39 = vpack.c.bf16 %v312_v35, %v312_v35 }
  0xc5   :  { %v483_v40 = vrot.slane %v482_v36, 4  ;;  %v367_v42 = vunpack.c.l.b16 %v361_v37  ;;  %v1220_v43 = vunpack.c.l.b16 %v490_v39 }
  0xc7   :  { %v484_v44 = vadd.f32 %v483_v40, %v482_v36  ;;  %v368_v45 = vpack.c.b16 %v367_v42, %v366_v41  ;;  %v511_v46 = vpack.c.b16 %v1220_v43, %v1218_v38  ;;  %v342_v36 = vld [vmem:[#allocation10 + $0x38] sm:$0xff]   ;;  %v340_v40 = vld [vmem:[#allocation10 + $0x30] sm:$0xff]  }
  0xc8   :  { %v358_v39 = vunpack.c.l.bf16 %v342_v36  ;;  %v357_v41 = vunpack.c.h.bf16 %v340_v40 }
  0xc9   :  { %v485_v48 = vrot.slane %v484_v44, 2  ;;  %370 = vxpose.xlu0.c.b16.start.end [1/1] (short) %v368_v45, 128  ;;  %v306_v54 = vpop.f32.mrf.mxu2 }
  0xca   :  { %v362_v55 = vpack.c.bf16 %v306_v54, %v306_v54 }
  0xcb   :  { %v486_v49 = vadd.f32 %v485_v48, %v484_v44  ;;  %v356_v44 = vunpack.c.l.bf16 %v340_v40  ;;  %v359_v48 = vunpack.c.h.bf16 %v342_v36  ;;  %v962_v40 = vld [vmem:[#allocation8 + $0x18] sm:$0xff] }
  0xcc   :  { %v388_v57 = vunpack.c.l.b16 %v362_v55 }
  0xcd   :  { %v487_v47 = vrot.slane %v486_v49, 1 }
  0xcf   :  { %v488_v50 = vadd.f32 %v487_v47, %v486_v49  ;;  %v338_v49 = vld [vmem:[#allocation10 + $0x28] sm:$0xff]  }
  0xd0   :  { %v355_v47 = vunpack.c.h.bf16 %v338_v49 }
  0xd1   :  { %v575_v51 = vmul.f32 %v488_v50, %v311_v29  ;;  %v576_v52 = vmul.f32 %v488_v50, %v312_v35  ;;  %v308_v56 = vpop.f32.mrf.mxu2 }
  0xd2   :  { %v363_v58 = vpack.c.bf16 %v308_v56, %v308_v56 }
  0xd3   :  { %v577_v53 = vpack.c.bf16 %v576_v52, %v575_v51  ;;  %v336_v52 = vld [vmem:[#allocation10 + $0x20] sm:$0xff]  }
  0xd4   :  { %v389_v59 = vunpack.c.l.b16 %v363_v58 }
  0xd5   :  { %634 = vmatmul.bf16.vlgmr.msrb.gmra.mxu1 %v577_v53  ;;  %v354_v53 = vunpack.c.l.bf16 %v338_v49 }
  0xd6   :  { %v390_v60 = vpack.c.b16 %v389_v59, %v388_v57  ;;  %v353_v57 = vunpack.c.h.bf16 %v336_v52 }
  0xd8   :  { %424 = vmatpush.bf16.msrb.mxu0 %v390_v60  ;;  %972 = vmatpush.bf16.msra.mxu3 %v390_v60 }
 0x175   :  { %v378_v61 = vpop.trf.xlu0 }
 0x176   :  { %854 = vmatmul.msk.bf16.vlgmr.msrb.gmra.mxu0 %vm392_vm2, %v378_v61  ;;  %v352_v61 = vunpack.c.l.bf16 %v336_v52 }
 0x185   :  { %v379_v62 = vpop.trf.xlu0 }
 0x186   :  { %855 = vmatmul.msk.bf16.gmra.mxu0 %vm392_vm2, %v379_v62 }
 0x195   :  { %v380_v63 = vpop.trf.xlu0 }
 0x196   :  { %856 = vmatmul.msk.bf16.vlgmr.msra.gmra.mxu3 %vm392_vm2, %v380_v63 }
 0x1a5   :  { %v381_v0 = vpop.trf.xlu0 }
 0x1a6   :  { %857 = vmatmul.msk.bf16.gmra.mxu3 %vm392_vm2, %v381_v0 }
 0x1b5   :  { %v382_v1 = vpop.trf.xlu0 }
 0x1b6   :  { %858 = vmatmul.msk.bf16.gmra.mxu3 %vm392_vm2, %v382_v1 }
 0x1c5   :  { %v383_v2 = vpop.trf.xlu0 }
 0x1c6   :  { %859 = vmatmul.msk.bf16.gmra.mxu3 %vm392_vm2, %v383_v2 }
 0x1d5   :  { %v384_v3 = vpop.trf.xlu0 }
 0x1d6   :  { %860 = vmatmul.msk.bf16.gmra.mxu3 %vm392_vm2, %v384_v3 }
 0x1e5   :  { %v385_v4 = vpop.trf.xlu0 }
 0x1e6   :  { %861 = vmatmul.msk.bf16.gmra.mxu3 %vm392_vm2, %v385_v4 }
 0x1f3   :  { %v1244_v35 = vpop.f32.mrf.mxu0 }
 0x1fb   :  { %v428_v42 = vpop.f32.mrf.mxu0 }
 0x203   :  { %v431_v2 = vpop.f32.mrf.mxu0 }
 0x219   :  { %v436_v6 = vpop.f32.mrf.mxu3 }
 0x21a   :  { %v470_v8 = vmul.f32 %v436_v6, %v348_v7  ;;  %v966_v7 = vld [vmem:[#allocation8 + $0x38] sm:$0xff] }
 0x21b   :  { %713 = vmatpush.bf16.msrb.mxu2 %v966_v7 }
 0x21c   :  { %v495_v11 = vpack.c.bf16 %v470_v8, %v470_v8 }
 0x21e   :  { %v1232_v14 = vunpack.c.l.b16 %v495_v11  ;;  %v965_v11 = vld [vmem:[#allocation8 + $0x30] sm:$0xff] }
 0x21f   :  { %714 = vmatpush.bf16.msrb.mxu2 %v965_v11 }
 0x221   :  { %v438_v10 = vpop.f32.mrf.mxu3 }
 0x222   :  { %v471_v12 = vmul.f32 %v438_v10, %v349_v9 }
 0x224   :  { %v496_v13 = vpack.c.bf16 %v471_v12, %v471_v12 }
 0x226   :  { %v1234_v15 = vunpack.c.l.b16 %v496_v13 }
 0x228   :  { %v547_v17 = vpack.c.b16 %v1234_v15, %v1232_v14 }
 0x229   :  { %v441_v18 = vpop.f32.mrf.mxu3 }
 0x22a   :  { %v472_v20 = vmul.f32 %v441_v18, %v350_v19  ;;  %v330_v18 = vld [vmem:[#allocation10 + $0x8] sm:$0xff]  }
 0x22c   :  { %v497_v23 = vpack.c.bf16 %v472_v20, %v472_v20 }
 0x22e   :  { %v1238_v26 = vunpack.c.l.b16 %v497_v23  ;;  %v346_v23 = vunpack.c.l.bf16 %v330_v18 }
 0x230   :  { %v468_v36 = vmul.f32 %v431_v2, %v346_v23 }
 0x231   :  { %v443_v22 = vpop.f32.mrf.mxu3 }
 0x232   :  { %v473_v24 = vmul.f32 %v443_v22, %v351_v21  ;;  %v964_v21 = vld [vmem:[#allocation8 + $0x28] sm:$0xff]  ;;  %v328_v22 = vld [vmem:[#allocation10] sm:$0xff]  }
 0x233   :  { %715 = vmatpush.bf16.msrb.mxu2 %v964_v21 }
 0x234   :  { %v498_v25 = vpack.c.bf16 %v473_v24, %v473_v24  ;;  %v347_v24 = vunpack.c.h.bf16 %v330_v18 }
 0x236   :  { %v1240_v27 = vunpack.c.l.b16 %v498_v25 }
 0x238   :  { %v548_v28 = vpack.c.b16 %v1240_v27, %v1238_v26  ;;  %v961_v26 = vld [vmem:[#allocation8 + $0x10] sm:$0xff]  ;;  %v960_v27 = vld [vmem:[#allocation8 + $0x8] sm:$0xff] }
 0x239   :  { %v446_v29 = vpop.f32.mrf.mxu3 }
 0x23a   :  { %v474_v8 = vmul.f32 %v446_v29, %v352_v61  ;;  %v433_v29 = vpop.f32.mrf.mxu0 }
 0x23c   :  { %v499_v19 = vpack.c.bf16 %v474_v8, %v474_v8 }
 0x241   :  { %v448_v30 = vpop.f32.mrf.mxu3 }
 0x242   :  { %v475_v3 = vmul.f32 %v448_v30, %v353_v57 }
 0x244   :  { %v500_v12 = vpack.c.bf16 %v475_v3, %v475_v3 }
 0x246   :  { %v538_v25 = vunpack.c.l.b16 %v500_v12 }
 0x249   :  { %v451_v31 = vpop.f32.mrf.mxu3 }
 0x24a   :  { %v476_v62 = vmul.f32 %v451_v31, %v354_v53  ;;  %v537_v31 = vunpack.c.l.b16 %v499_v19 }
 0x24c   :  { %v501_v9 = vpack.c.bf16 %v476_v62, %v476_v62 }
 0x24e   :  { %v539_v20 = vunpack.c.l.b16 %v501_v9 }
 0x251   :  { %v453_v32 = vpop.f32.mrf.mxu3 }
 0x252   :  { %v477_v58 = vmul.f32 %v453_v32, %v355_v47  ;;  %v344_v32 = vunpack.c.l.bf16 %v328_v22 }
 0x254   :  { %v502_v4 = vpack.c.bf16 %v477_v58, %v477_v58 }
 0x256   :  { %v540_v13 = vunpack.c.l.b16 %v502_v4 }
 0x258   :  { %v550_v30 = vpack.c.b16 %v540_v13, %v539_v20 }
 0x259   :  { %v456_v33 = vpop.f32.mrf.mxu3 }
 0x25a   :  { %v478_v54 = vmul.f32 %v456_v33, %v356_v44  ;;  %v963_v33 = vld [vmem:[#allocation8 + $0x20] sm:$0xff] }
 0x25b   :  { %716 = vmatpush.bf16.msrb.mxu2 %v963_v33 }
 0x25c   :  { %v503_v63 = vpack.c.bf16 %v478_v54, %v478_v54 }
 0x25e   :  { %v541_v10 = vunpack.c.l.b16 %v503_v63 }
 0x25f   :  { %717 = vmatpush.bf16.msrb.mxu2 %v962_v40 }
 0x261   :  { %v458_v34 = vpop.f32.mrf.mxu3 }
 0x262   :  { %v479_v50 = vmul.f32 %v458_v34, %v357_v41  ;;  %v345_v34 = vunpack.c.h.bf16 %v328_v22  ;;  %v466_v41 = vmul.f32 %v1244_v35, %v344_v32 }
 0x263   :  { %718 = vmatpush.bf16.msrb.mxu2 %v961_v26 }
 0x264   :  { %v504_v59 = vpack.c.bf16 %v479_v50, %v479_v50  ;;  %v467_v44 = vmul.f32 %v428_v42, %v345_v34  ;;  %v491_v49 = vpack.c.bf16 %v466_v41, %v466_v41  ;;  %v635_v42 = vpop.f32.mrf.mxu1 }
 0x265   :  { %v636_v14 = vadd.f32 1e-06, %v635_v42 }
 0x266   :  { %v542_v5 = vunpack.c.l.b16 %v504_v59  ;;  %v492_v47 = vpack.c.bf16 %v467_v44, %v467_v44  ;;  %v529_v52 = vunpack.c.l.b16 %v491_v49 }
 0x267   :  { %719 = vmatpush.bf16.msrb.mxu2 %v960_v27  ;;  %987 = vrcp.f32 %v636_v14 }
 0x268   :  { %v551_v16 = vpack.c.b16 %v542_v5, %v541_v10  ;;  %v530_v53 = vunpack.c.l.b16 %v492_v47 }
 0x269   :  { %v461_v37 = vpop.f32.mrf.mxu3 }
 0x26a   :  { %v480_v45 = vmul.f32 %v461_v37, %v358_v39  ;;  %v469_v37 = vmul.f32 %v433_v29, %v347_v24  ;;  %v549_v39 = vpack.c.b16 %v538_v25, %v537_v31  ;;  %v545_v35 = vpack.c.b16 %v530_v53, %v529_v52 }
 0x26c   :  { %v505_v55 = vpack.c.bf16 %v480_v45, %v480_v45  ;;  %v493_v45 = vpack.c.bf16 %v468_v36, %v468_v36 }
 0x26e   :  { %v543_v0 = vunpack.c.l.b16 %v505_v55  ;;  %v531_v50 = vunpack.c.l.b16 %v493_v45  ;;  %v637_v55 = vpop.f32.mrf.mxu1 }
 0x26f   :  { %v638_v15 = vadd.f32 1e-06, %v637_v55 }
 0x271   :  { %v463_v51 = vpop.f32.mrf.mxu3  ;;  %989 = vrcp.f32 %v638_v15 }
 0x272   :  { %v481_v56 = vmul.f32 %v463_v51, %v359_v48  ;;  %v494_v48 = vpack.c.bf16 %v469_v37, %v469_v37 }
 0x274   :  { %v506_v60 = vpack.c.bf16 %v481_v56, %v481_v56  ;;  %v532_v51 = vunpack.c.l.b16 %v494_v48  ;;  %v988_v56 = vpop.eup %987 }
 0x276   :  { %v544_v1 = vunpack.c.l.b16 %v506_v60  ;;  %v546_v54 = vpack.c.b16 %v532_v51, %v531_v50 }
 0x277   :  { %v990_v57 = vpop.eup %989 }
 0x278   :  { %v552_v6 = vpack.c.b16 %v544_v1, %v543_v0 }
 0x27a   :  { %561 = vmatpush.bf16.msra.mxu0 %v552_v6 }
 0x27e   :  { %562 = vmatpush.bf16.msra.mxu0 %v551_v16 }
 0x282   :  { %563 = vmatpush.bf16.msra.mxu0 %v550_v30 }
 0x286   :  { %564 = vmatpush.bf16.msra.mxu0 %v549_v39 }
 0x28a   :  { %565 = vmatpush.bf16.msra.mxu0 %v548_v28  ;;  %v959_v28 = vld [vmem:[#allocation8] sm:$0xff] }
 0x28b   :  { %720 = vmatpush.bf16.msrb.mxu2 %v959_v28 }
 0x28e   :  { %566 = vmatpush.bf16.msra.mxu0 %v547_v17 }
 0x292   :  { %567 = vmatpush.bf16.msra.mxu0 %v546_v54 }
 0x296   :  { %568 = vmatpush.bf16.msra.mxu0 %v545_v35 }
 0x299   :  { %569 = vmatmul.bf16.vlgmr.msra.gmra.mxu0 %v511_v46  ;;  %v986_v46 = vld [vmem:[%s1269_s4] ss:$0 sm:$0xff] }
 0x316   :  { %v570_v17 = vpop.f32.mrf.mxu0 }
 0x317   :  { %v642_v59 = vmul.f32 %v988_v56, %v570_v17 }
 0x31e   :  { %v572_v58 = vpop.f32.mrf.mxu0 }
 0x31f   :  { %v643_v60 = vmul.f32 %v990_v57, %v572_v58 }
 0x321   :  { %v644_v38 = vpack.c.bf16 %v643_v60, %v642_v59 }
 0x323   :  { %721 = vmatmul.bf16.vlgmr.msrb.gmra.mxu2 %v644_v38 }
 0x3a6   :  { %v722_v43 = vpop.f32.mrf.mxu2 }
 0x3a7   :  { %v723_v62 = vadd.f32 %v986_v46, %v722_v43 }
 0x3ae   :  { %v724_v61 = vpop.f32.mrf.mxu2 }
 0x3af   :  { %v725_v63 = vadd.f32 %v986_v46, %v724_v61 }
 0x3b1   :  { %v970_v0 = vpack.c.bf16 %v725_v63, %v723_v62 }
 0x3b3   :  { %971 = vst [vmem:[#allocation11] sm:$0xff] %v970_v0  }
 0x3b4   :  { %743 = dma.vmem_to_hbm [thread:$0]  %s736_s24, 128, %s738_s27, [#allocation4], %s1144_s29, %s1144_s29, %s1145_s30  }
 0x3b5   :  { %1141 = dma.done.wait [#allocation4], 128  }
 0x3b6   :  { %1142 = vsyncadd [#allocation4], 4294967168 }
 0x3b7   :  { %748 = vsyncpa [#allocation3], 1 }
 0x3b8   :  { %749 = vsyncpa [#allocation6], 1 }
 0x3b9   :  { %750 = vsyncpa [#allocation9], 1 }
 0x3ba   :  { %751 = vsyncpa [#allocation4], 1 }

</bundles_post_ra>
